<compile_context>
chip_gen: v7x
topology: tpu7x:2x2x1
jax: 0.10.0
libtpu: 0.0.40
codegen_flags: <defaults>
</compile_context>

<pallas_src>
import functools

import jax
import jax.numpy as jnp
from jax import lax
from jax.experimental import pallas as pl
from jax.experimental.pallas import tpu as pltpu


def _make_loss_kernel(lambda_: float, total_b: int):
    lam = float(lambda_)
    total_b = int(total_b)

    def kernel(emb_ref, logits_ref, tgt_ref, out_ref):
        pid = pl.program_id(0)

        # Zero the resident accumulator on the first grid step.
        @pl.when(pid == 0)
        def _():
            out_ref[...] = jnp.zeros_like(out_ref)

        # Native-dtype DMA (bf16-friendly); upcast to f32 for compute.
        emb = emb_ref[...].astype(jnp.float32)       # (TB, E)
        logits = logits_ref[...].astype(jnp.float32)  # (TB, C)
        tgt = tgt_ref[...]                            # (TB, 1) int32

        TB, E = emb.shape
        _, C = logits.shape

        # Only pay for padding masks when the last block is partial (static).
        needs_mask = (total_b % TB) != 0
        if needs_mask:
            row_ids = pid * TB + lax.broadcasted_iota(jnp.int32, (TB, 1), 0)
            valid = (row_ids < total_b).astype(jnp.float32)   # (TB, 1)
            emb = emb * valid
            logits = logits * valid

        # Single one-hot, reused for both the cosine pick and the CE pick
        # (E == C is the module's implicit assumption; asserted in the wrapper).
        onehot = (lax.broadcasted_iota(jnp.int32, (TB, E), 1) == tgt).astype(jnp.float32)
        if C == E:
            onehot_c = onehot
        else:
            onehot_c = (lax.broadcasted_iota(jnp.int32, (TB, C), 1) == tgt).astype(jnp.float32)

        # --- Cosine loss: pick-then-rsqrt (no (TB,E) divide pass) ---
        sumsq = jnp.sum(emb * emb, axis=1, keepdims=True)        # (TB, 1)
        picked_e = jnp.sum(emb * onehot, axis=1, keepdims=True)  # (TB, 1)
        dot = picked_e * lax.rsqrt(jnp.maximum(sumsq, 1e-30))    # (TB, 1)
        cos_rows = 1.0 - dot                                     # (TB, 1)

        # --- Cross entropy: logsumexp - picked logit ---
        m = jnp.max(logits, axis=1, keepdims=True)                       # (TB, 1)
        lse = m + jnp.log(jnp.sum(jnp.exp(logits - m), axis=1, keepdims=True))
        picked_c = jnp.sum(logits * onehot_c, axis=1, keepdims=True)     # (TB, 1)
        ce_rows = lse - picked_c                                         # (TB, 1)

        if needs_mask:
            cos_rows = cos_rows * valid
            ce_rows = ce_rows * valid

        partial = jnp.sum(cos_rows) + lam * jnp.sum(ce_rows)
        out_ref[...] += jnp.reshape(partial, (1, 1))

        # Finalize: divide the accumulated sums by the true batch size.
        @pl.when(pid == pl.num_programs(0) - 1)
        def _():
            out_ref[...] = out_ref[...] * (1.0 / total_b)

    return kernel


@functools.partial(jax.jit, static_argnames=("lambda_", "block_b"))
def cosine_cross_entropy_loss(class_embedded, inputs, target, lambda_, *, block_b=128):
    """JAX wrapper mirroring CosineCrossEntropyLoss.forward (inputs.shape[1] > 1 path)."""
    B, E = class_embedded.shape
    Bi, C = inputs.shape
    assert Bi == B, "batch mismatch between class_embedded and inputs"
    if C <= 1:
        # TODO(synk): BCE-with-logits branch (inputs.shape[1] == 1) not implemented.
        raise NotImplementedError("BCE-with-logits branch not implemented")
    # The PyTorch module implicitly requires one_hot width == embedding width.
    assert E == C, "CosineCrossEntropyLoss assumes embedding width == num_classes"

    tgt2d = target.reshape(-1).astype(jnp.int32).reshape(B, 1)

    if B <= block_b:
        tb = B
    else:
        assert block_b % 8 == 0, "block_b must be a multiple of 8"
        tb = block_b
    grid = (pl.cdiv(B, tb),)

    cost = pl.CostEstimate(
        flops=int(B * (4 * E + 6 * C)),
        transcendentals=int(B * C + 2 * B),
        bytes_accessed=int(
            class_embedded.size * class_embedded.dtype.itemsize
            + inputs.size * inputs.dtype.itemsize
            + 4 * B + 4
        ),
    )

    out = pl.pallas_call(
        _make_loss_kernel(lambda_, B),
        out_shape=jax.ShapeDtypeStruct((1, 1), jnp.float32),
        grid=grid,
        in_specs=[
            pl.BlockSpec((tb, E), lambda i: (i, 0)),
            pl.BlockSpec((tb, C), lambda i: (i, 0)),
            pl.BlockSpec((tb, 1), lambda i: (i, 0)),
        ],
        out_specs=pl.BlockSpec((1, 1), lambda i: (0, 0)),
        compiler_params=pltpu.CompilerParams(dimension_semantics=("arbitrary",)),
        cost_estimate=cost,
    )(class_embedded, inputs, tgt2d)
    return out[0, 0]


def _reference(class_embedded, inputs, target, lambda_):
    """Pure-JAX reference matching the PyTorch module."""
    t = target.reshape(-1).astype(jnp.int32)
    E = class_embedded.shape[1]
    C = inputs.shape[1]
    ce32 = class_embedded.astype(jnp.float32)
    lg32 = inputs.astype(jnp.float32)
    oh_e = jax.nn.one_hot(t, E, dtype=jnp.float32)
    normalized = ce32 / jnp.linalg.norm(ce32, axis=1, keepdims=True)
    cos_loss = jnp.mean(1.0 - jnp.sum(normalized * oh_e, axis=1))
    logp = jax.nn.log_softmax(lg32, axis=1)
    ce = -jnp.mean(jnp.sum(jax.nn.one_hot(t, C, dtype=jnp.float32) * logp, axis=1))
    return cos_loss + lambda_ * ce


if __name__ == "__main__":
    B, E, C = 16, 32, 32  # E == C == num_classes
    lambda_ = 0.5

    key = jax.random.PRNGKey(0)
    k1, k2, k3 = jax.random.split(key, 3)
    class_embedded = jax.random.normal(k1, (B, E), dtype=jnp.float32)
    logits = jax.random.normal(k2, (B, C), dtype=jnp.float32)
    target = jax.random.randint(k3, (B,), 0, E, dtype=jnp.int32)

    # block_b=8 -> grid of 2 batch tiles, exercising the accumulator pipeline.
    out = cosine_cross_entropy_loss(class_embedded, logits, target, lambda_, block_b=8)
    out = jax.block_until_ready(out)

    ref = _reference(class_embedded, logits, target, lambda_)
    assert jnp.allclose(out, ref, atol=1e-5, rtol=1e-5), (out, ref)

    print("KERNEL_OK")
</pallas_src>

<mosaic_0001>
module attributes {stable_mosaic.version = 11 : i64} {
  func.func @kernel(%arg0: i32, %arg1: memref<8x32xf32, #tpu.memory_space<vmem>>, %arg2: memref<8x32xf32, #tpu.memory_space<vmem>>, %arg3: memref<8x1xi32, #tpu.memory_space<vmem>>, %arg4: memref<1x1xf32, #tpu.memory_space<vmem>>) attributes {dimension_semantics = [#tpu.dimension_semantics<arbitrary>], iteration_bounds = array<i64: 2>, scalar_prefetch = 0 : i64, scratch_operands = 0 : i64, tpu.core_type = #tpu.core_type<tc>, window_params = [{transform_indices = @transform_0, window_bounds = array<i64: 8, 32>}, {transform_indices = @transform_1, window_bounds = array<i64: 8, 32>}, {transform_indices = @transform_2, window_bounds = array<i64: 8, 1>}, {pipeline_mode = #tpu.pipeline_mode<synchronous>, transform_indices = @transform_3, window_bounds = array<i64: 1, 1>}]} {
    %c0_i32 = arith.constant 0 : i32
    %0 = arith.cmpi eq, %arg0, %c0_i32 : i32
    %1 = arith.extui %0 : i1 to i32
    %c0_i32_0 = arith.constant 0 : i32
    %2 = arith.cmpi ne, %1, %c0_i32_0 : i32
    scf.if %2 {
      %cst_20 = arith.constant 0.000000e+00 : f32
      %53 = vector.broadcast %cst_20 : f32 to vector<1x1xf32>
      %c0_21 = arith.constant 0 : index
      %c0_22 = arith.constant 0 : index
      %54 = vector.load %arg4[%c0_21, %c0_22] : memref<1x1xf32, #tpu.memory_space<vmem>>, vector<1x1xf32>
      tpu.vector_store %arg4[%c0_21, %c0_22], %53 {strides = array<i32>} : memref<1x1xf32, #tpu.memory_space<vmem>>, vector<1x1xf32>,
    } else {
    }
    %c0 = arith.constant 0 : index
    %c0_1 = arith.constant 0 : index
    %3 = vector.load %arg1[%c0, %c0_1] : memref<8x32xf32, #tpu.memory_space<vmem>>, vector<8x32xf32>
    %c0_2 = arith.constant 0 : index
    %c0_3 = arith.constant 0 : index
    %4 = vector.load %arg2[%c0_2, %c0_3] : memref<8x32xf32, #tpu.memory_space<vmem>>, vector<8x32xf32>
    %c0_4 = arith.constant 0 : index
    %c0_5 = arith.constant 0 : index
    %5 = vector.load %arg3[%c0_4, %c0_5] : memref<8x1xi32, #tpu.memory_space<vmem>>, vector<8x1xi32>
    %6 = tpu.iota {dimensions = array<i32: 1>} : vector<8x32xi32>
    %7 = vector.broadcast %5 : vector<8x1xi32> to vector<8x32xi32>
    %8 = arith.cmpi eq, %6, %7 : vector<8x32xi32>
    %9 = arith.extui %8 : vector<8x32xi1> to vector<8x32xi32>
    %10 = arith.sitofp %9 : vector<8x32xi32> to vector<8x32xf32>
    %11 = arith.mulf %3, %3 : vector<8x32xf32>
    %cst = arith.constant dense<0.000000e+00> : vector<8xf32>
    %12 = vector.multi_reduction <add>, %11, %cst [1] : vector<8x32xf32> to vector<8xf32>
    %13 = vector.shape_cast %12 : vector<8xf32> to vector<8x1xf32>
    %14 = arith.mulf %3, %10 : vector<8x32xf32>
    %cst_6 = arith.constant dense<0.000000e+00> : vector<8xf32>
    %15 = vector.multi_reduction <add>, %14, %cst_6 [1] : vector<8x32xf32> to vector<8xf32>
    %16 = vector.shape_cast %15 : vector<8xf32> to vector<8x1xf32>
    %cst_7 = arith.constant 1.000000e-30 : f32
    %17 = vector.broadcast %cst_7 : f32 to vector<8x1xf32>
    %18 = arith.maximumf %13, %17 : vector<8x1xf32>
    %19 = math.rsqrt %18 : vector<8x1xf32>
    %20 = arith.mulf %16, %19 : vector<8x1xf32>
    %cst_8 = arith.constant 1.000000e+00 : f32
    %21 = vector.broadcast %cst_8 : f32 to vector<8x1xf32>
    %22 = arith.subf %21, %20 : vector<8x1xf32>
    %cst_9 = arith.constant dense<0xFF800000> : vector<8xf32>
    %23 = vector.multi_reduction <maximumf>, %4, %cst_9 [1] : vector<8x32xf32> to vector<8xf32>
    %24 = vector.shape_cast %23 : vector<8xf32> to vector<8x1xf32>
    %25 = vector.broadcast %24 : vector<8x1xf32> to vector<8x32xf32>
    %26 = arith.subf %4, %25 : vector<8x32xf32>
    %27 = math.exp %26 : vector<8x32xf32>
    %cst_10 = arith.constant dense<0.000000e+00> : vector<8xf32>
    %28 = vector.multi_reduction <add>, %27, %cst_10 [1] : vector<8x32xf32> to vector<8xf32>
    %29 = vector.shape_cast %28 : vector<8xf32> to vector<8x1xf32>
    %30 = math.log %29 : vector<8x1xf32>
    %31 = arith.addf %24, %30 : vector<8x1xf32>
    %32 = arith.mulf %4, %10 : vector<8x32xf32>
    %cst_11 = arith.constant dense<0.000000e+00> : vector<8xf32>
    %33 = vector.multi_reduction <add>, %32, %cst_11 [1] : vector<8x32xf32> to vector<8xf32>
    %34 = vector.shape_cast %33 : vector<8xf32> to vector<8x1xf32>
    %35 = arith.subf %31, %34 : vector<8x1xf32>
    %36 = vector.shape_cast %22 : vector<8x1xf32> to vector<1x8x1xf32>
    %cst_12 = arith.constant dense<0.000000e+00> : vector<1xf32>
    %37 = vector.multi_reduction <add>, %36, %cst_12 [1, 2] : vector<1x8x1xf32> to vector<1xf32>
    %38 = vector.shape_cast %37 : vector<1xf32> to vector<1x1x1xf32>
    %39 = vector.extract %38[0, 0, 0] : f32 from vector<1x1x1xf32>
    %40 = vector.shape_cast %35 : vector<8x1xf32> to vector<1x8x1xf32>
    %cst_13 = arith.constant dense<0.000000e+00> : vector<1xf32>
    %41 = vector.multi_reduction <add>, %40, %cst_13 [1, 2] : vector<1x8x1xf32> to vector<1xf32>
    %42 = vector.shape_cast %41 : vector<1xf32> to vector<1x1x1xf32>
    %43 = vector.extract %42[0, 0, 0] : f32 from vector<1x1x1xf32>
    %cst_14 = arith.constant 5.000000e-01 : f32
    %44 = arith.mulf %cst_14, %43 : f32
    %45 = arith.addf %39, %44 : f32
    %c0_15 = arith.constant 0 : index
    %c0_16 = arith.constant 0 : index
    %46 = vector.load %arg4[%c0_15, %c0_16] : memref<1x1xf32, #tpu.memory_space<vmem>>, vector<1x1xf32>
    %47 = vector.broadcast %45 : f32 to vector<1x1xf32>
    %48 = arith.addf %46, %47 : vector<1x1xf32>
    %c0_17 = arith.constant 0 : index
    %c0_18 = arith.constant 0 : index
    %49 = vector.load %arg4[%c0_17, %c0_18] : memref<1x1xf32, #tpu.memory_space<vmem>>, vector<1x1xf32>
    tpu.vector_store %arg4[%c0_17, %c0_18], %48 {strides = array<i32>} : memref<1x1xf32, #tpu.memory_space<vmem>>, vector<1x1xf32>,
    %c1_i32 = arith.constant 1 : i32
    %50 = arith.cmpi eq, %arg0, %c1_i32 : i32
    %51 = arith.extui %50 : i1 to i32
    %c0_i32_19 = arith.constant 0 : i32
    %52 = arith.cmpi ne, %51, %c0_i32_19 : i32
    scf.if %52 {
      %c0_20 = arith.constant 0 : index
      %c0_21 = arith.constant 0 : index
      %53 = vector.load %arg4[%c0_20, %c0_21] : memref<1x1xf32, #tpu.memory_space<vmem>>, vector<1x1xf32>
      %cst_22 = arith.constant 6.250000e-02 : f32
      %54 = vector.broadcast %cst_22 : f32 to vector<1x1xf32>
      %55 = arith.mulf %53, %54 : vector<1x1xf32>
      %c0_23 = arith.constant 0 : index
      %c0_24 = arith.constant 0 : index
      %56 = vector.load %arg4[%c0_23, %c0_24] : memref<1x1xf32, #tpu.memory_space<vmem>>, vector<1x1xf32>
      tpu.vector_store %arg4[%c0_23, %c0_24], %55 {strides = array<i32>} : memref<1x1xf32, #tpu.memory_space<vmem>>, vector<1x1xf32>,
    } else {
    }
    return
  }
  func.func @transform_0(%arg0: i32) -> (i32, i32) {
    %c0_i32 = arith.constant 0 : i32
    %c0_i32_0 = arith.constant 0 : i32
    return %arg0, %c0_i32 : i32, i32
  }
  func.func @transform_1(%arg0: i32) -> (i32, i32) {
    %c0_i32 = arith.constant 0 : i32
    %c0_i32_0 = arith.constant 0 : i32
    return %arg0, %c0_i32 : i32, i32
  }
  func.func @transform_2(%arg0: i32) -> (i32, i32) {
    %c0_i32 = arith.constant 0 : i32
    %c0_i32_0 = arith.constant 0 : i32
    return %arg0, %c0_i32 : i32, i32
  }
  func.func @transform_3(%arg0: i32) -> (i32, i32) {
    %c0_i32 = arith.constant 0 : i32
    %c0_i32_0 = arith.constant 0 : i32
    %c0_i32_1 = arith.constant 0 : i32
    return %c0_i32, %c0_i32_0 : i32, i32
  }
}

</mosaic_0001>

<bundles_post_ra>
// kernel: cosine_cross_entropy_loss.1
= control target key start
LH: loop header
LB: loop body
LE: loop exit
PB: predicated region body
PF: predicated region fallthrough
CT: control target
= control target key end

     0   :  { %8 = vsyncpa [#allocation3], 0  ;;  %s708_s0 = inlined_call_operand.vmem [shape: f32[16,32], index: 0, kind: input, shape index: {}]   ;;  %s709_s1 = inlined_call_operand.hbm [shape: f32[16,32], index: 1, kind: input, shape index: {}]   ;;  %s710_s2 = inlined_call_operand.vmem [shape: s32[16,1], index: 2, kind: input, shape index: {}]   ;;  %s711_s3 = inlined_call_operand.hbm [shape: f32[1,1], index: 3, kind: output, shape index: {}]  }
   0x1   :  { %10 = vsyncpa [#allocation3 + $0x1], 0 }
   0x2   :  { %11 = vsyncpa [#allocation4], 0  ;;  %s568_s12 = smov 0   ;;  %s570_s13 = smov 0  }
   0x3   :  { %s572_s14 = smov 0   ;;  %s574_s15 = smov 0  }
   0x4 LB: > { %s587_s16 = sadd.s32 4294967295, %s541_s15   ;;  %s590_s17 = sadd.s32 1, %s541_s15   ;;  %s541_s15 = sphi %s574_s15, %s719_s15   ;;  %s537_s14 = sphi %s572_s14, %s718_s14   ;;  %s533_s13 = sphi %s570_s13, %s717_s13   ;;  %s529_s12 = sphi %s568_s12, %s716_s12  }
   0x5   : > { %s47_s18 = ssub.s32 %s541_s15, %s590_s17  ;;  %s50_s19 = sadd.s32 1, %s537_s14 }
   0x6   : > { %p48_p0 = scmp.eq.s32.totalorder %s47_s18, 0  ;;  %p57_p1 = scmp.ne.s32.totalorder %s537_s14, %s533_s13 }
   0x7   : > { %p58_p2 = scmp.eq.s32.totalorder %s541_s15, 0  ;;  %p63_p3 = scmp.ne.s32.totalorder %s533_s13, %s529_s12 }
   0x8   : > { %s600_s20 = scalar_select %p48_p0, %s537_s14, %s50_s19  }
   0x9   : > { %p59_p4 = por %p58_p2, %p57_p1  ;;  %p64_p5 = scmp.eq.s32.totalorder %s587_s16, 0 }
   0xa   : > { %p401_p6 = scmp.lt.s32.totalorder %s541_s15, 2  ;;  %s141_s22 = sand.u32 1, %s537_s14  }
   0xb   : > { %p604_p7 = por %p64_p5, %p63_p3  ;;  %s374_s23 = sshll.u32 %s141_s22, 3 }
   0xc   : > { %s375_s24 = sshll.u32 %s541_s15, 7  ;;  %s145_s28 = scalar_lea.vmem [#allocation2], %s374_s23 }
   0xd   : > { %s613_s27 = scalar_lea.hbm %s709_s1, %s375_s24  ;;  %s152_s29 = sshll.u32 %s145_s28, 4  ;;  %s615_s29 = int_to_ptr.vmem [resolvable:$true] %s152_s29 }
   0xe   : > { %p617_p8 = pnand %p401_p6, %p59_p4  ;;  %s142_s4 = scalar_lea.sflag [#allocation3], %s141_s22 }
   0xf   : > { %s447_s5 = scalar_lea.hbm %s613_s27, 128  ;;  %s452_s8 = scalar_lea.hbm %s709_s1, 256 }
  0x10   : > { %p448_p11 = scmp.ne.s32.totalorder %s613_s27, %s447_s5  ;;  %p449_p12 = pneg %p617_p8 }
  0x11   : > { %p453_p1 = scmp.lt.u32.totalorder %s613_s27, %s709_s1  ;;  %p454_p2 = scmp.lt.u32.totalorder %s452_s8, %s447_s5 }
  0x12   : > { %p450_p13 = pnand %p449_p12, %p448_p11  ;;  %p456_p4 = scmp.lt.u32.totalorder %s447_s5, %s613_s27 }
  0x13   : > { %p455_p3 = por %p454_p2, %p453_p1 }
  0x14   : > { %p451_p0 = pneg %p450_p13 }
  0x15   : > { %p457_p5 = por %p456_p4, %p455_p3 }
  0x17   : > { %p458_p6 = pnand %p457_p5, %p451_p0 }
  0x19   : > { %461 = shalt.err (!%p458_p6)
}
  0x1a   : > { %s462_s11 = scalar_lea.vmem %s615_s29, 128  ;;  %s543_s12 = smov [#allocation2]  }
  0x1b   : > { %p463_p11 = scmp.ne.s32.totalorder %s615_s29, %s462_s11  ;;  %s467_s18 = sshll.u32 %s543_s12, 4  ;;  %s468_s18 = int_to_ptr.vmem [resolvable:$false] %s467_s18 }
  0x1c   : > { %s469_s19 = scalar_lea.vmem %s468_s18, 256  ;;  %p470_p10 = scmp.lt.s32.totalorder %s615_s29, %s468_s18 }
  0x1d   : > { %p465_p13 = pnand %p463_p11, %p449_p12  ;;  %p471_p1 = scmp.lt.s32.totalorder %s469_s19, %s462_s11 }
  0x1f   : > { %p466_p9 = pneg %p465_p13  ;;  %p472_p2 = por %p471_p1, %p470_p10 }
  0x21   : > { %p473_p3 = pnand %p472_p2, %p466_p9 }
  0x23   : > { %476 = shalt.err (!%p473_p3)
}
  0x24   : > { %400 = dma.hbm_to_vmem [thread:$0]  (!%p617_p8), %s613_s27, 128, %s615_s29, %s142_s4  }
  0x25   : > { %p714_p0 = scmp.lt.s32.totalorder %s541_s15, 3  ;;  %p715_p4 = scmp.ge.s32.totalorder %s541_s15, 1 }
  0x27   : > { %p165_p12 = pnand %p715_p4, %p714_p0 }
  0x28   : > { %s170_s22 = sand.u32 (!%p165_p12), 1, %s533_s13  }
  0x29   : > { %168 = sbr.rel (%p165_p12) target bundleno = 626 (0x272), region = 32  ;;  %s377_s23 = sshll.u32 (!%p165_p12), %s170_s22, 3 }
  0x2a   : > { %s171_s24 = scalar_lea.sflag (!%p165_p12), [#allocation3], %s170_s22  ;;  %s174_s25 = scalar_lea.vmem (!%p165_p12), [#allocation2], %s377_s23 }
  0x30   : > { %520 = dma.done.wait (%p604_p7), %s171_s24, 128  }
  0x31   : > { %522 = vsyncadd (%p604_p7), %s171_s24, 4294967168  ;;  %p200_p9 = scmp.lt.s32.totalorder %s587_s16, 1  ;;  %p380_p8 = scmp.ne.s32.totalorder %s587_s16, 0 }
  0x32   : > { %vm212_vm0 = vcmask (!%p380_p8), 0   ;;  %v544_v0 = vmov (!%p380_p8), 0.0  }
  0x33   : > { %s201_s26 = scalar_select %p200_p9, %s587_s16, 1 }
  0x34   : > { %211 = sbr.rel (%p380_p8) target bundleno = 59 (0x3b), region = 40  ;;  %213 = vst.msk [vmem:[#allocation5] sm:$0x1] (!%p380_p8), %vm212_vm0, %v544_v0 }
  0x35   : > { %s378_s27 = sshll.u32 %s201_s26, 3 }
  0x36   : > { %s203_s29 = scalar_lea.vmem %s708_s0, %s378_s27  ;;  %s207_s5 = scalar_lea.vmem %s710_s2, %s378_s27 }
  0x3b PF: > { %v215_v1 = vld [vmem:[%s174_s25] sm:$0xff]  ;;  %vm226_vm1 = vcmask 261120   ;;  %v545_v3 = vmov 0   ;;  %v217_v10 = vlaneseq  ;;  %v546_v14 = vmov 0.0   ;;  %v278_v50 = vld [vmem:[#allocation5] sm:$0x1] }
  0x3c   : > { %v238_v2 = vsel %vm226_vm1, %v215_v1, -inf  ;;  %440 = vset.pattern.permute.xlu0 %v545_v3  ;;  %v214_v4 = vld [vmem:[%s203_s29] sm:$0xff]  ;;  %vm255_vm3 = vcmask 7168   ;;  %vm281_vm4 = vcmask 0   ;;  %p382_p7 = scmp.ne.s32.totalorder %s587_s16, 1 }
  0x3d   : > { %239 = vmax.xlane.f32.xlu0 %v238_v2  ;;  %v225_v5 = vmul.f32 %v214_v4, %v214_v4  ;;  %v216_v6 = vld [vmem:[%s207_s5] sm:$0xff]  ;;  %v218_v12 = vand.u32 127, %v217_v10 }
  0x3f   : > { %v227_v7 = vsel %vm226_vm1, %v225_v5, 0.0 }
  0x40   : > { %228 = vadd.xlane.f32.xlu1 %v227_v7 }
  0x53   : > { %220 = vperm.xlu0 %440, %v216_v6  }
  0xca   : > { %v240_v8 = vpop.xlane.xlu0 %239 }
  0xcb   : > { %v241_v9 = vsub.f32 %v215_v1, %v240_v8 }
  0xcd   : > { %v242_v11 = vmul.f32 1.442695, %v241_v9  ;;  %v229_v22 = vpop.xlane.xlu1 %228 }
  0xce   : > { %v234_v23 = vmax.f32 %v229_v22, 1e-30 }
  0xcf   : > { %441 = vpow2.f32 %v242_v11 }
  0xd0   : > { %443 = vrsqrt.f32 %v234_v23 }
  0xd2   : > { %v221_v13 = vpop.permute.xlu0 %220 }
  0xd3   : > { %vm222_vm2 = vcmp.eq.s32.totalorder %v218_v12, %v221_v13 }
  0xd4   : > { %v381_v15 = vsel %vm222_vm2, 1.0, %v546_v14 }
  0xd5   : > { %v230_v16 = vmul.f32 %v381_v15, %v214_v4  ;;  %v250_v20 = vmul.f32 %v381_v15, %v215_v1 }
  0xd7   : > { %v231_v19 = vsel %vm226_vm1, %v230_v16, 0.0  ;;  %v251_v21 = vsel %vm226_vm1, %v250_v20, 0.0 }
  0xd9   : > { %v442_v17 = vpop.eup %441 }
  0xda   : > { %v244_v18 = vsel %vm226_vm1, %v442_v17, 0.0  ;;  %v444_v25 = vpop.eup %443 }
  0xdb   : > { %245 = vadd.xlane.f32.xlu1 %v244_v18 }
  0xdf   : > { %232 = vadd.xlane.f32.xlu1 %v231_v19 }
  0xe3   : > { %252 = vadd.xlane.f32.xlu1 %v251_v21 }
 0x168   : > { %v246_v24 = vpop.xlane.xlu1 %245 }
 0x169   : > { %445 = vlog2.f32 %v246_v24 }
 0x16c   : > { %v233_v26 = vpop.xlane.xlu1 %232 }
 0x16d   : > { %v236_v27 = vmul.f32 %v444_v25, %v233_v26 }
 0x16f   : > { %v237_v28 = vsub.f32 1.0, %v236_v27 }
 0x170   : > { %v253_v33 = vpop.xlane.xlu1 %252 }
 0x171   : > { %v256_v29 = vsel %vm255_vm3, %v237_v28, 0.0 }
 0x172   : > { %257 = vadd.xlane.f32.xlu1 %v256_v29 }
 0x173   : > { %v446_v30 = vpop.eup %445 }
 0x174   : > { %v248_v31 = vmul.f32 0.6931472, %v446_v30 }
 0x176   : > { %v249_v32 = vadd.f32 %v248_v31, %v240_v8 }
 0x178   : > { %v254_v34 = vsub.f32 %v249_v32, %v253_v33 }
 0x17a   : > { %v266_v35 = vsel %vm255_vm3, %v254_v34, 0.0 }
 0x17b   : > { %267 = vadd.xlane.f32.xlu1 %v266_v35 }
 0x1ff   : > { %v258_v36 = vpop.xlane.xlu1 %257 }
 0x200   : > { %v259_v37 = vrot.slane %v258_v36, 4 }
 0x202   : > { %v260_v38 = vadd.f32 %v259_v37, %v258_v36 }
 0x204   : > { %v261_v39 = vrot.slane %v260_v38, 2 }
 0x206   : > { %v262_v40 = vadd.f32 %v261_v39, %v260_v38 }
 0x208   : > { %v268_v41 = vpop.xlane.xlu1 %267  ;;  %v263_v42 = vrot.slane %v262_v40, 1 }
 0x209   : > { %v269_v43 = vrot.slane %v268_v41, 4 }
 0x20a   : > { %v264_v44 = vadd.f32 %v263_v42, %v262_v40 }
 0x20b   : > { %v270_v45 = vadd.f32 %v269_v43, %v268_v41 }
 0x20c   : > { %387 = vpush %v264_v44 }
 0x20d   : > { %v271_v46 = vrot.slane %v270_v45, 2 }
 0x20f   : > { %v272_v47 = vadd.f32 %v271_v46, %v270_v45 }
 0x211   : > { %v273_v48 = vrot.slane %v272_v47, 1 }
 0x213   : > { %v274_v49 = vadd.f32 %v273_v48, %v272_v47 }
 0x215   : > { %389 = vpush %v274_v49 }
 0x23d   : > { %s388_s21 = spop %387 }
 0x246   : > { %s390_s6 = spop %389 }
 0x247   : > { %s276_s7 = smul.f32 0.5, %s390_s6 }
 0x248   : > { %286 = sbr.rel (%p382_p7) target bundleno = 601 (0x259), region = 44 }
 0x249   : > { %s277_s8 = sadd.f32 %s388_s21, %s276_s7 }
 0x24b   : > { %v279_v51 = vstv %s277_s8 }
 0x24c   : > { %v280_v52 = vadd.f32 %v279_v51, %v278_v50 }
 0x24e   : > { %282 = vst.msk [vmem:[#allocation5] sm:$0x1] %vm281_vm4, %v280_v52 }
 0x255   : > { %v287_v53 = vld [vmem:[#allocation5] sm:$0x1] }
 0x256   : > { %v288_v54 = vmul.f32 0.0625, %v287_v53 }
 0x258   : > { %289 = vst.msk [vmem:[#allocation5] sm:$0x1] %vm281_vm4, %v288_v54 }
 0x259 PF: > { %p402_p10 = scmp.eq.s32.totalorder %s587_s16, 1  ;;  %s547_s9 = smov [#allocation5]  }
 0x25a   : > { %s297_s10 = sshll.u32 %s547_s9, 4  ;;  %s298_s10 = int_to_ptr.vmem [resolvable:$true] %s297_s10 }
 0x25b   : > { %s477_s11 = scalar_lea.vmem %s298_s10, 16  ;;  %s483_s12 = scalar_lea.vmem %s298_s10, 32 }
 0x25c   : > { %p478_p5 = scmp.ne.s32.totalorder %s298_s10, %s477_s11  ;;  %p484_p13 = scmp.lt.s32.totalorder %s298_s10, %s298_s10 }
 0x25d   : > { %p485_p1 = scmp.lt.s32.totalorder %s483_s12, %s477_s11 }
 0x25e   : > { %p479_p6 = pnand %p478_p5, %p402_p10 }
 0x25f   : > { %p486_p2 = por %p485_p1, %p484_p13 }
 0x260   : > { %p480_p11 = pneg %p479_p6 }
 0x262   : > { %p487_p3 = pnand %p486_p2, %p480_p11 }
 0x264   : > { %490 = shalt.err (!%p487_p3)
}
 0x265   : > { %s491_s22 = scalar_lea.hbm %s711_s3, 16 }
 0x266   : > { %p492_p0 = scmp.ne.s32.totalorder %s711_s3, %s491_s22  ;;  %p497_p9 = scmp.lt.u32.totalorder %s491_s22, %s711_s3 }
 0x268   : > { %p493_p4 = pnand %p492_p0, %p402_p10 }
 0x26a   : > { %p494_p12 = pneg %p493_p4 }
 0x26c   : > { %p499_p8 = pnand %p497_p9, %p494_p12 }
 0x26e   : > { %502 = shalt.err (!%p499_p8)
}
 0x26f   : > { %394 = dma.vmem_to_hbm [thread:$0]  (%p402_p10), %s298_s10, 16, %s711_s3, [#allocation4]  }
 0x270   : > { %524 = dma.done.wait (%p402_p10), [#allocation4], 16  }
 0x271   : > { %526 = vsyncadd (%p402_p10), [#allocation4], 4294967280 }
 0x272 PF: > { %p14_p7 = scmp.ge.s32.totalorder %s590_s17, 4   ;;  %s716_s12 = smov %s533_s13 }
 0x273   : > { %s717_s13 = smov %s537_s14  ;;  %s718_s14 = smov %s600_s20 }
 0x274   : > { %s719_s15 = smov %s590_s17  ;;  %16 = sbr.rel (!%p14_p7) target bundleno = 4 (0x4), region = 83 }
 0x27b   :  { %310 = vsyncpa [#allocation3], 1 }
 0x27c   :  { %312 = vsyncpa [#allocation3 + $0x1], 1 }
 0x27d   :  { %313 = vsyncpa [#allocation4], 1 }
 0x27e   :  { %315 = vsyncpa [#allocation4 + $0x1], 1 }

</bundles_post_ra>
